<compile_context>
chip_gen: v6e
topology: v6e:2x2x1
jax: 0.10.0
libtpu: 0.0.40
codegen_flags: <defaults>
</compile_context>

<pallas_src>
import functools

import jax
import jax.numpy as jnp
from jax.experimental import pallas as pl
from jax.experimental.pallas import tpu as pltpu

_LANE = 128
_SUBLANE = 8
# ~4 MiB of input-dtype bytes per input per grid step.
_TILE_TARGET_BYTES = 4 * 1024 * 1024
# Above this total size, force >= 2 grid steps (v7x has 2 TensorCores).
_MIN_SPLIT_BYTES = 2 * 1024 * 1024
# Safe scoped-VMEM budget on every generation (v5e/v6e/v7x).
_VMEM_LIMIT_BYTES = 32 * 1024 * 1024


# --------------------------------------------------------------------------
# Kernels
# --------------------------------------------------------------------------
def _soft_ce_rows_kernel(x_ref, t_ref, o_ref, *, total_rows, tm):
    """2-D layout: tile = (tm, C), class axis on lanes. Writes one partial block."""
    i = pl.program_id(0)
    x = x_ref[...].astype(jnp.float32)
    t = t_ref[...].astype(jnp.float32)

    # numerically stable log_softmax along the class (last) axis
    m = jnp.max(x, axis=-1, keepdims=True)
    shifted = x - m
    lse = jnp.log(jnp.sum(jnp.exp(shifted), axis=-1, keepdims=True))
    prod = t * (shifted - lse)

    o_ref[...] = jnp.full(o_ref.shape, -jnp.sum(prod), dtype=jnp.float32)

    if total_rows % tm != 0:
        # Ragged last tile: padded VMEM rows hold undefined data.  Recompute the
        # partial with a select (not a multiply) on the final grid step only.
        @pl.when(i == pl.num_programs(0) - 1)
        def _():
            row_id = i * tm + jax.lax.broadcasted_iota(jnp.int32, prod.shape, 0)
            masked = jnp.where(row_id < total_rows, prod, 0.0)
            o_ref[...] = jnp.full(o_ref.shape, -jnp.sum(masked), dtype=jnp.float32)


def _soft_ce_class_axis1_kernel(x_ref, t_ref, o_ref, *, n_total, bn, s_total, bs):
    """NCHW layouts: block (bn, C, bs[, 128]); the class axis is axis 1.

    Shared by the (8,128)-aligned 4-D layout (N, C, HW/128, 128) and the 3-D
    layout (N, C, HW): axis 0 = batch tile, axis 1 = classes, axis 2 = the
    (possibly ragged) spatial / spatial-chunk axis.
    """
    bi = pl.program_id(0)
    sj = pl.program_id(1)
    x = x_ref[...].astype(jnp.float32)
    t = t_ref[...].astype(jnp.float32)

    # numerically stable log_softmax along the class axis (== torch dim=1)
    m = jnp.max(x, axis=1, keepdims=True)
    shifted = x - m
    lse = jnp.log(jnp.sum(jnp.exp(shifted), axis=1, keepdims=True))
    prod = t * (shifted - lse)

    def write_partial(p):
        # Stage the reduction: class axis first, then the small remainder.
        o_ref[...] = jnp.full(o_ref.shape, -jnp.sum(jnp.sum(p, axis=1)),
                              dtype=jnp.float32)

    write_partial(prod)

    ragged_b = n_total % bn != 0
    ragged_s = s_total % bs != 0
    if ragged_b or ragged_s:
        conds = []
        if ragged_b:
            conds.append(bi == pl.num_programs(0) - 1)
        if ragged_s:
            conds.append(sj == pl.num_programs(1) - 1)

        @pl.when(functools.reduce(jnp.logical_or, conds))
        def _():
            masked = prod
            if ragged_b:
                b_id = bi * bn + jax.lax.broadcasted_iota(jnp.int32, prod.shape, 0)
                masked = jnp.where(b_id < n_total, masked, 0.0)
            if ragged_s:
                s_id = sj * bs + jax.lax.broadcasted_iota(jnp.int32, prod.shape, 2)
                masked = jnp.where(s_id < s_total, masked, 0.0)
            write_partial(masked)


# --------------------------------------------------------------------------
# Tile pickers (byte-based, dtype-aware)
# --------------------------------------------------------------------------
def _round_down(v, unit):
    return (v // unit) * unit


def _pick_row_tile(rows, row_bytes):
    """Row tile for the 2-D layout: multiple of 8, or the full row count."""
    if rows * row_bytes <= _MIN_SPLIT_BYTES:
        return rows                                        # one block; full dims legal
    tm = max(_SUBLANE, _round_down(_TILE_TARGET_BYTES // row_bytes, _SUBLANE))
    half = max(_SUBLANE, _round_down(rows // 2, _SUBLANE))  # leave >=2 steps (v7x 2 TCs)
    tm = min(tm, half)
    return rows if tm >= rows else tm


def _fit_tile(total, unit, elem_bytes):
    """Largest multiple of `unit` (or `total` itself) fitting the byte target."""
    if total * elem_bytes <= _TILE_TARGET_BYTES:
        return total
    t = max(unit, _round_down(_TILE_TARGET_BYTES // elem_bytes, unit))
    return total if t >= total else t


# --------------------------------------------------------------------------
# pallas_call wrappers
# --------------------------------------------------------------------------
def _soft_ce_2d(x2d, t2d):
    rows, c = x2d.shape
    tm = _pick_row_tile(rows, c * x2d.dtype.itemsize)
    grid_m = pl.cdiv(rows, tm)

    kernel = functools.partial(_soft_ce_rows_kernel, total_rows=rows, tm=tm)
    partials = pl.pallas_call(
        kernel,
        out_shape=jax.ShapeDtypeStruct((grid_m, _SUBLANE, _LANE), jnp.float32),
        grid_spec=pltpu.PrefetchScalarGridSpec(
            num_scalar_prefetch=0,
            grid=(grid_m,),
            in_specs=[
                pl.BlockSpec((tm, c), lambda i: (i, 0)),
                pl.BlockSpec((tm, c), lambda i: (i, 0)),
            ],
            out_specs=pl.BlockSpec((1, _SUBLANE, _LANE), lambda i: (i, 0, 0)),
        ),
        compiler_params=pltpu.CompilerParams(
            dimension_semantics=("parallel",),   # each step owns its output block
            vmem_limit_bytes=_VMEM_LIMIT_BYTES,
        ),
    )(x2d, t2d)

    return jnp.sum(partials[:, 0, 0]) / jnp.float32(rows)


def _soft_ce_nchw(x, t):
    n, c, h, w = x.shape
    hw = h * w
    itemsize = x.dtype.itemsize

    if hw % _LANE == 0:
        # (8,128)-aligned layout: free reshape; class axis becomes a plain
        # (non-sublane) axis -> pure VPU class reduce, no sublane padding for
        # small C, last two block dims always (8,128)-friendly.
        s_total = hw // _LANE
        xr = x.reshape(n, c, s_total, _LANE)
        tr = t.reshape(n, c, s_total, _LANE)
        elem_bytes = c * _LANE * itemsize        # bytes per spatial chunk per batch elem
        unit_s = _SUBLANE
        make_block = lambda bn_, bs_: (bn_, c, bs_, _LANE)
        in_map = lambda b, j: (b, 0, j, 0)
    else:
        # Fallback layout: class axis on sublanes, H*W lane-dense.
        s_total = hw
        xr = x.reshape(n, c, hw)
        tr = t.reshape(n, c, hw)
        elem_bytes = c * itemsize
        unit_s = _LANE
        make_block = lambda bn_, bs_: (bn_, c, bs_)
        in_map = lambda b, j: (b, 0, j)

    # Spatial tile first, then batch tile up to the ~4 MiB/input target.
    bs = _fit_tile(s_total, unit_s, elem_bytes)
    bn = _fit_tile(n, 1, bs * elem_bytes)
    grid_n, grid_s = pl.cdiv(n, bn), pl.cdiv(s_total, bs)

    # v7x has two TensorCores: a non-trivial problem should have >= 2 grid steps.
    if grid_n * grid_s == 1 and n * s_total * elem_bytes > _MIN_SPLIT_BYTES:
        if n >= 2:
            bn = max(1, n // 2)
        else:
            bs = max(unit_s, _round_down(s_total // 2, unit_s))
        grid_n, grid_s = pl.cdiv(n, bn), pl.cdiv(s_total, bs)

    kernel = functools.partial(_soft_ce_class_axis1_kernel,
                               n_total=n, bn=bn, s_total=s_total, bs=bs)
    block = make_block(bn, bs)
    partials = pl.pallas_call(
        kernel,
        out_shape=jax.ShapeDtypeStruct((grid_n, grid_s, _SUBLANE, _LANE), jnp.float32),
        grid_spec=pltpu.PrefetchScalarGridSpec(
            num_scalar_prefetch=0,
            grid=(grid_n, grid_s),
            in_specs=[
                pl.BlockSpec(block, in_map),
                pl.BlockSpec(block, in_map),
            ],
            out_specs=pl.BlockSpec((1, 1, _SUBLANE, _LANE), lambda b, j: (b, j, 0, 0)),
        ),
        compiler_params=pltpu.CompilerParams(
            dimension_semantics=("parallel", "parallel"),
            vmem_limit_bytes=_VMEM_LIMIT_BYTES,
        ),
    )(xr, tr)

    return jnp.sum(partials[:, :, 0, 0]) / jnp.float32(n * hw)


def soft_cross_entropy_loss(inputs, soft_targets):
    """Mean soft-target cross entropy. inputs/soft_targets: (N, C) or (N, C, H, W)."""
    assert inputs.shape == soft_targets.shape

    if inputs.ndim == 2:
        return _soft_ce_2d(inputs, soft_targets)

    if inputs.ndim == 4:
        n, c, h, w = inputs.shape
        itemsize = inputs.dtype.itemsize
        # Smallest NCHW tile is one 128-wide spatial chunk over all C classes;
        # keep 2 inputs x 2 pipeline buffers of it well inside the VMEM budget.
        if c * _LANE * itemsize * 4 <= (_VMEM_LIMIT_BYTES * 3) // 4:
            return _soft_ce_nchw(inputs, soft_targets)
        # Enormous class dim: fall back to the lane-dense row layout.
        # TODO(synk): replace this HBM transpose with an in-kernel two-pass /
        # online log-sum-exp over class chunks (class-chunk grid axis marked
        # "arbitrary", m/lse accumulators in VMEM scratch).
        x2 = jnp.transpose(inputs, (0, 2, 3, 1)).reshape(n * h * w, c)
        t2 = jnp.transpose(soft_targets, (0, 2, 3, 1)).reshape(n * h * w, c)
        return _soft_ce_2d(x2, t2)

    raise ValueError("expected 2-D (N, C) or 4-D (N, C, H, W) inputs")


# --------------------------------------------------------------------------
# Reference + demo
# --------------------------------------------------------------------------
def _reference(inputs, soft_targets):
    log_p = jax.nn.log_softmax(inputs.astype(jnp.float32), axis=1)
    ce = -jnp.sum(soft_targets.astype(jnp.float32) * log_p, axis=1)
    return jnp.mean(ce)


if __name__ == "__main__":
    key = jax.random.PRNGKey(0)
    k1, k2, k3, k4 = jax.random.split(key, 4)

    # 4-D NCHW case: batch=2, channels=4, spatial 16x16 (softmax over dim=1).
    x4 = jax.random.normal(k1, (2, 4, 16, 16), dtype=jnp.float32)
    t4 = jax.nn.softmax(
        jax.random.normal(k2, (2, 4, 16, 16), dtype=jnp.float32), axis=1)
    loss4 = jax.block_until_ready(soft_cross_entropy_loss(x4, t4))
    ref4 = _reference(x4, t4)
    assert jnp.allclose(loss4, ref4, atol=1e-5, rtol=1e-5), (loss4, ref4)

    # 2-D classification case: batch=16, classes=32.
    x2 = jax.random.normal(k3, (16, 32), dtype=jnp.float32)
    t2 = jax.nn.softmax(
        jax.random.normal(k4, (16, 32), dtype=jnp.float32), axis=1)
    loss2 = jax.block_until_ready(soft_cross_entropy_loss(x2, t2))
    ref2 = _reference(x2, t2)
    assert jnp.allclose(loss2, ref2, atol=1e-5, rtol=1e-5), (loss2, ref2)

    print("KERNEL_OK")
</pallas_src>

<mosaic_0001>
module attributes {stable_mosaic.version = 11 : i64} {
  func.func @_soft_ce_class_axis1_kernel(%arg0: i32, %arg1: i32, %arg2: memref<2x4x2x128xf32, #tpu.memory_space<vmem>>, %arg3: memref<2x4x2x128xf32, #tpu.memory_space<vmem>>, %arg4: memref<1x1x8x128xf32, #tpu.memory_space<vmem>>) attributes {dimension_semantics = [#tpu.dimension_semantics<parallel>, #tpu.dimension_semantics<parallel>], iteration_bounds = array<i64: 1, 1>, scalar_prefetch = 0 : i64, scratch_operands = 0 : i64, tpu.core_type = #tpu.core_type<tc>, window_params = [{transform_indices = @transform_0, window_bounds = array<i64: 2, 4, 2, 128>}, {transform_indices = @transform_1, window_bounds = array<i64: 2, 4, 2, 128>}, {transform_indices = @transform_2, window_bounds = array<i64: 1, 1, 8, 128>}]} {
    %c0 = arith.constant 0 : index
    %c0_0 = arith.constant 0 : index
    %c0_1 = arith.constant 0 : index
    %c0_2 = arith.constant 0 : index
    %0 = vector.load %arg2[%c0, %c0_0, %c0_1, %c0_2] : memref<2x4x2x128xf32, #tpu.memory_space<vmem>>, vector<2x4x2x128xf32>
    %c0_3 = arith.constant 0 : index
    %c0_4 = arith.constant 0 : index
    %c0_5 = arith.constant 0 : index
    %c0_6 = arith.constant 0 : index
    %1 = vector.load %arg3[%c0_3, %c0_4, %c0_5, %c0_6] : memref<2x4x2x128xf32, #tpu.memory_space<vmem>>, vector<2x4x2x128xf32>
    %cst = arith.constant dense<0xFF800000> : vector<2x2x128xf32>
    %2 = vector.multi_reduction <maximumf>, %0, %cst [1] : vector<2x4x2x128xf32> to vector<2x2x128xf32>
    %3 = vector.shape_cast %2 : vector<2x2x128xf32> to vector<2x1x2x128xf32>
    %4 = vector.broadcast %3 : vector<2x1x2x128xf32> to vector<2x4x2x128xf32>
    %5 = arith.subf %0, %4 : vector<2x4x2x128xf32>
    %6 = math.exp %5 : vector<2x4x2x128xf32>
    %cst_7 = arith.constant dense<0.000000e+00> : vector<2x2x128xf32>
    %7 = vector.multi_reduction <add>, %6, %cst_7 [1] : vector<2x4x2x128xf32> to vector<2x2x128xf32>
    %8 = vector.shape_cast %7 : vector<2x2x128xf32> to vector<2x1x2x128xf32>
    %9 = math.log %8 : vector<2x1x2x128xf32>
    %10 = vector.broadcast %9 : vector<2x1x2x128xf32> to vector<2x4x2x128xf32>
    %11 = arith.subf %5, %10 : vector<2x4x2x128xf32>
    %12 = arith.mulf %1, %11 : vector<2x4x2x128xf32>
    %cst_8 = arith.constant dense<0.000000e+00> : vector<2x2x128xf32>
    %13 = vector.multi_reduction <add>, %12, %cst_8 [1] : vector<2x4x2x128xf32> to vector<2x2x128xf32>
    %14 = vector.shape_cast %13 : vector<2x2x128xf32> to vector<1x2x2x128xf32>
    %cst_9 = arith.constant dense<0.000000e+00> : vector<1xf32>
    %15 = vector.multi_reduction <add>, %14, %cst_9 [1, 2, 3] : vector<1x2x2x128xf32> to vector<1xf32>
    %16 = vector.shape_cast %15 : vector<1xf32> to vector<1x1x1x1xf32>
    %17 = vector.extract %16[0, 0, 0, 0] : f32 from vector<1x1x1x1xf32>
    %cst_10 = arith.constant 0.000000e+00 : f32
    %18 = arith.subf %cst_10, %17 : f32
    %19 = vector.broadcast %18 : f32 to vector<1x1x8x128xf32>
    %c0_11 = arith.constant 0 : index
    %c0_12 = arith.constant 0 : index
    %c0_13 = arith.constant 0 : index
    %c0_14 = arith.constant 0 : index
    %20 = vector.load %arg4[%c0_11, %c0_12, %c0_13, %c0_14] : memref<1x1x8x128xf32, #tpu.memory_space<vmem>>, vector<1x1x8x128xf32>
    tpu.vector_store %arg4[%c0_11, %c0_12, %c0_13, %c0_14], %19 {strides = array<i32>} : memref<1x1x8x128xf32, #tpu.memory_space<vmem>>, vector<1x1x8x128xf32>,
    return
  }
  func.func @transform_0(%arg0: i32, %arg1: i32) -> (i32, i32, i32, i32) {
    %c0_i32 = arith.constant 0 : i32
    %c0_i32_0 = arith.constant 0 : i32
    %c0_i32_1 = arith.constant 0 : i32
    return %arg0, %c0_i32, %arg1, %c0_i32_0 : i32, i32, i32, i32
  }
  func.func @transform_1(%arg0: i32, %arg1: i32) -> (i32, i32, i32, i32) {
    %c0_i32 = arith.constant 0 : i32
    %c0_i32_0 = arith.constant 0 : i32
    %c0_i32_1 = arith.constant 0 : i32
    return %arg0, %c0_i32, %arg1, %c0_i32_0 : i32, i32, i32, i32
  }
  func.func @transform_2(%arg0: i32, %arg1: i32) -> (i32, i32, i32, i32) {
    %c0_i32 = arith.constant 0 : i32
    %c0_i32_0 = arith.constant 0 : i32
    %c0_i32_1 = arith.constant 0 : i32
    return %arg0, %arg1, %c0_i32, %c0_i32_0 : i32, i32, i32, i32
  }
}

</mosaic_0001>

<bundles_post_ra>
// kernel: tpu_custom_call.1
= control target key start
LH: loop header
LB: loop body
LE: loop exit
PB: predicated region body
PF: predicated region fallthrough
CT: control target
= control target key end

     0   :  { %7 = vsyncpa [#allocation3], 0  ;;  %s342_s0 = inlined_call_operand.hbm [shape: f32[2,4,2,128], index: 0, kind: input, shape index: {}]   ;;  %s343_s1 = inlined_call_operand.hbm [shape: f32[2,4,2,128], index: 1, kind: input, shape index: {}]   ;;  %s344_s2 = inlined_call_operand.hbm [shape: f32[1,1,8,128], index: 2, kind: output, shape index: {}]  }
   0x1   :  { %8 = vsyncpa [#allocation6], 0 }
   0x2   :  { %9 = vsyncpa [#allocation4], 0  ;;  %s267_s9 = smov [#allocation2]  }
   0x3   :  { %s15_s10 = sshll.u32 %s267_s9, 4  ;;  %s16_s10 = int_to_ptr.vmem [resolvable:$true] %s15_s10 }
   0x4   :  { %s209_s11 = scalar_lea.vmem %s16_s10, 256  ;;  %p214_p1 = scmp.lt.s32.totalorder %s16_s10, %s16_s10 }
   0x5   :  { %p210_p0 = scmp.ne.s32.totalorder %s16_s10, %s209_s11  ;;  %p215_p2 = scmp.lt.s32.totalorder %s209_s11, %s209_s11 }
   0x7   :  { %p216_p3 = por %p215_p2, %p214_p1 }
   0x9   :  { %p217_p4 = pnand %p216_p3, %p210_p0 }
   0xb   :  { %220 = shalt.err (!%p217_p4)
}
   0xc   :  { %s268_s12 = smov 32   ;;  %s269_s13 = smov 2  }
   0xd   :  { %21 = dma.hbm_to_vmem [thread:$0]  %s342_s0, 256, %s16_s10, [#allocation3], %s268_s12, %s268_s12, %s269_s13  }
   0xe   :  { %s270_s16 = smov [#allocation5]  }
   0xf   :  { %s27_s17 = sshll.u32 %s270_s16, 4  ;;  %s28_s17 = int_to_ptr.vmem [resolvable:$true] %s27_s17 }
  0x10   :  { %s229_s18 = scalar_lea.vmem %s28_s17, 256  ;;  %p234_p6 = scmp.lt.s32.totalorder %s28_s17, %s28_s17 }
  0x11   :  { %p230_p5 = scmp.ne.s32.totalorder %s28_s17, %s229_s18  ;;  %p235_p7 = scmp.lt.s32.totalorder %s229_s18, %s229_s18 }
  0x13   :  { %p236_p8 = por %p235_p7, %p234_p6 }
  0x15   :  { %p237_p9 = pnand %p236_p8, %p230_p5 }
  0x17   :  { %240 = shalt.err (!%p237_p9)
}
  0x18   :  { %33 = dma.hbm_to_vmem [thread:$0]  %s343_s1, 256, %s28_s17, [#allocation6], %s268_s12, %s268_s12, %s269_s13  }
  0x19   :  { %261 = dma.done.wait [#allocation3], 256  }
  0x1a   :  { %262 = vsyncadd [#allocation3], 4294967040 }
  0x1b   :  { %263 = dma.done.wait [#allocation6], 256  }
  0x1c   :  { %264 = vsyncadd [#allocation6], 4294967040  ;;  %v40_v0 = vld [vmem:[#allocation2] sm:$0x3]  ;;  %vm56_vm0 = vcmask 1041408   ;;  %s271_s0 = smov [#allocation7]  }
  0x1d   :  { %v41_v1 = vld [vmem:[#allocation2 + $0x2] sm:$0x3]  ;;  %v42_v2 = vld [vmem:[#allocation2 + $0x4] sm:$0x3]  ;;  %v43_v3 = vld [vmem:[#allocation2 + $0x6] sm:$0x3] }
  0x1e   :  { %v44_v4 = vld [vmem:[#allocation2 + $0x8] sm:$0x3]  ;;  %v45_v5 = vld [vmem:[#allocation2 + $0xa] sm:$0x3]  ;;  %v46_v6 = vld [vmem:[#allocation2 + $0xc] sm:$0x3] }
  0x1f   :  { %v47_v7 = vld [vmem:[#allocation2 + $0xe] sm:$0x3]  ;;  %v57_v8 = vsel %vm56_vm0, %v40_v0, -inf  ;;  %v58_v9 = vsel %vm56_vm0, %v41_v1, -inf  ;;  %v59_v10 = vsel %vm56_vm0, %v42_v2, -inf  ;;  %v61_v11 = vsel %vm56_vm0, %v43_v3, -inf }
  0x20   :  { %v60_v12 = vmax.f32 %v57_v8, %v59_v10  ;;  %v62_v13 = vmax.f32 %v58_v9, %v61_v11  ;;  %v64_v14 = vsel %vm56_vm0, %v44_v4, -inf  ;;  %v65_v15 = vsel %vm56_vm0, %v45_v5, -inf  ;;  %v48_v62 = vld [vmem:[#allocation5] sm:$0x3]  ;;  %v49_v63 = vld [vmem:[#allocation5 + $0x2] sm:$0x3] }
  0x21   :  { %v66_v16 = vsel %vm56_vm0, %v46_v6, -inf  ;;  %v68_v17 = vsel %vm56_vm0, %v47_v7, -inf  ;;  %s164_s1 = sshll.u32 %s271_s0, 4  ;;  %s165_s1 = int_to_ptr.vmem [resolvable:$true] %s164_s1 }
  0x22   :  { %v63_v18 = vmax.f32 %v60_v12, %v62_v13  ;;  %v67_v19 = vmax.f32 %v64_v14, %v66_v16  ;;  %v69_v20 = vmax.f32 %v65_v15, %v68_v17  ;;  %v53_v12 = vld [vmem:[#allocation5 + $0xa] sm:$0x3]  ;;  %v54_v13 = vld [vmem:[#allocation5 + $0xc] sm:$0x3]  ;;  %v55_v14 = vld [vmem:[#allocation5 + $0xe] sm:$0x3]  ;;  %p246_p11 = scmp.lt.s32.totalorder %s165_s1, %s165_s1 }
  0x23   :  { %s241_s23 = scalar_lea.vmem %s165_s1, 128 }
  0x24   :  { %v70_v21 = vmax.f32 %v67_v19, %v69_v20  ;;  %v71_v22 = vsub.f32 %v40_v0, %v63_v18  ;;  %v72_v23 = vsub.f32 %v41_v1, %v63_v18  ;;  %v73_v24 = vsub.f32 %v42_v2, %v63_v18  ;;  %v50_v0 = vld [vmem:[#allocation5 + $0x4] sm:$0x3]  ;;  %v51_v1 = vld [vmem:[#allocation5 + $0x6] sm:$0x3]  ;;  %p242_p10 = scmp.ne.s32.totalorder %s165_s1, %s241_s23  ;;  %p247_p12 = scmp.lt.s32.totalorder %s241_s23, %s241_s23 }
  0x25   :  { %v301_v25 = vsub.f32 %v43_v3, %v63_v18 }
  0x26   :  { %v303_v26 = vsub.f32 %v44_v4, %v70_v21  ;;  %v305_v27 = vsub.f32 %v45_v5, %v70_v21  ;;  %v307_v28 = vsub.f32 %v46_v6, %v70_v21  ;;  %v79_v29 = vmul.f32 1.442695, %v71_v22  ;;  %p248_p13 = por %p247_p12, %p246_p11 }
  0x27   :  { %v81_v30 = vmul.f32 1.442695, %v72_v23  ;;  %v83_v31 = vmul.f32 1.442695, %v73_v24  ;;  %v309_v32 = vsub.f32 %v47_v7, %v70_v21  ;;  %v85_v33 = vmul.f32 1.442695, %v301_v25 }
  0x28   :  { %181 = vpow2.f32 %v79_v29  ;;  %v87_v34 = vmul.f32 1.442695, %v303_v26  ;;  %v89_v35 = vmul.f32 1.442695, %v305_v27  ;;  %v91_v36 = vmul.f32 1.442695, %v307_v28  ;;  %p249_p0 = pnand %p248_p13, %p242_p10 }
  0x29   :  { %183 = vpow2.f32 %v81_v30  ;;  %v93_v37 = vmul.f32 1.442695, %v309_v32  ;;  %v52_v7 = vld [vmem:[#allocation5 + $0x8] sm:$0x3] }
  0x2a   :  { %185 = vpow2.f32 %v83_v31 }
  0x2b   :  { %187 = vpow2.f32 %v85_v33 }
  0x2c   :  { %189 = vpow2.f32 %v87_v34 }
  0x2d   :  { %191 = vpow2.f32 %v89_v35 }
  0x2e   :  { %193 = vpow2.f32 %v91_v36 }
  0x2f   :  { %195 = vpow2.f32 %v93_v37 }
  0x35   :  { %v182_v38 = vpop.eup %181 }
  0x36   :  { %v184_v39 = vpop.eup %183  ;;  %v95_v40 = vsel %vm56_vm0, %v182_v38, 0.0 }
  0x37   :  { %v186_v41 = vpop.eup %185  ;;  %v96_v42 = vsel %vm56_vm0, %v184_v39, 0.0 }
  0x38   :  { %v188_v43 = vpop.eup %187  ;;  %v97_v44 = vadd.f32 %v96_v42, %v95_v40  ;;  %v98_v45 = vsel %vm56_vm0, %v186_v41, 0.0 }
  0x39   :  { %v190_v46 = vpop.eup %189  ;;  %v100_v47 = vsel %vm56_vm0, %v188_v43, 0.0 }
  0x3a   :  { %v192_v48 = vpop.eup %191  ;;  %v99_v49 = vadd.f32 %v98_v45, %v97_v44  ;;  %v102_v50 = vsel %vm56_vm0, %v190_v46, 0.0 }
  0x3b   :  { %v194_v51 = vpop.eup %193  ;;  %v103_v52 = vsel %vm56_vm0, %v192_v48, 0.0 }
  0x3c   :  { %v196_v53 = vpop.eup %195  ;;  %v101_v54 = vadd.f32 %v100_v47, %v99_v49  ;;  %v104_v55 = vadd.f32 %v103_v52, %v102_v50  ;;  %v105_v56 = vsel %vm56_vm0, %v194_v51, 0.0 }
  0x3d   :  { %v107_v57 = vsel %vm56_vm0, %v196_v53, 0.0 }
  0x3e   :  { %v106_v58 = vadd.f32 %v105_v56, %v104_v55  ;;  %197 = vlog2.f32 %v101_v54 }
  0x40   :  { %v108_v59 = vadd.f32 %v107_v57, %v106_v58 }
  0x42   :  { %199 = vlog2.f32 %v108_v59 }
  0x4b   :  { %v198_v60 = vpop.eup %197 }
  0x4c   :  { %v110_v61 = vmul.f32 0.6931472, %v198_v60 }
  0x4e   :  { %v113_v2 = vsub.f32 %v71_v22, %v110_v61  ;;  %v114_v3 = vsub.f32 %v72_v23, %v110_v61  ;;  %v115_v4 = vsub.f32 %v73_v24, %v110_v61  ;;  %v116_v5 = vsub.f32 %v301_v25, %v110_v61 }
  0x4f   :  { %v200_v6 = vpop.eup %199 }
  0x50   :  { %v112_v8 = vmul.f32 0.6931472, %v200_v6  ;;  %v121_v9 = vmul.f32 %v113_v2, %v48_v62  ;;  %v122_v10 = vmul.f32 %v114_v3, %v49_v63  ;;  %v123_v11 = vmul.f32 %v115_v4, %v50_v0 }
  0x51   :  { %v124_v15 = vmul.f32 %v116_v5, %v51_v1 }
  0x52   :  { %v117_v16 = vsub.f32 %v303_v26, %v112_v8  ;;  %v118_v17 = vsub.f32 %v305_v27, %v112_v8  ;;  %v119_v18 = vsub.f32 %v307_v28, %v112_v8  ;;  %v120_v19 = vsub.f32 %v309_v32, %v112_v8 }
  0x53   :  { %v129_v20 = vsel %vm56_vm0, %v121_v9, 0.0  ;;  %v130_v21 = vsel %vm56_vm0, %v122_v10, 0.0  ;;  %v132_v22 = vsel %vm56_vm0, %v123_v11, 0.0  ;;  %v134_v31 = vsel %vm56_vm0, %v124_v15, 0.0 }
  0x54   :  { %v125_v23 = vmul.f32 %v117_v16, %v52_v7  ;;  %v126_v24 = vmul.f32 %v118_v17, %v53_v12  ;;  %v127_v25 = vmul.f32 %v119_v18, %v54_v13  ;;  %v128_v29 = vmul.f32 %v120_v19, %v55_v14 }
  0x55   :  { %v131_v30 = vadd.f32 %v130_v21, %v129_v20 }
  0x56   :  { %v136_v26 = vsel %vm56_vm0, %v125_v23, 0.0  ;;  %v137_v27 = vsel %vm56_vm0, %v126_v24, 0.0  ;;  %v139_v28 = vsel %vm56_vm0, %v127_v25, 0.0  ;;  %v141_v34 = vsel %vm56_vm0, %v128_v29, 0.0 }
  0x57   :  { %v133_v32 = vadd.f32 %v132_v22, %v131_v30  ;;  %v138_v33 = vadd.f32 %v137_v27, %v136_v26 }
  0x59   :  { %v135_v35 = vadd.f32 %v134_v31, %v133_v32  ;;  %v140_v36 = vadd.f32 %v139_v28, %v138_v33 }
  0x5b   :  { %v142_v37 = vadd.f32 %v141_v34, %v140_v36  ;;  %v143_v38 = vsel %vm56_vm0, %v135_v35, 0.0 }
  0x5d   :  { %v144_v39 = vsel %vm56_vm0, %v142_v37, 0.0 }
  0x5e   :  { %v145_v40 = vadd.f32 %v144_v39, %v143_v38 }
  0x60   :  { %146 = vadd.xlane.f32.xlu0 %v145_v40 }
  0xe9   :  { %v147_v41 = vpop.xlane.xlu0 %146 }
  0xea   :  { %v148_v42 = vrot.slane %v147_v41, 4 }
  0xec   :  { %v149_v43 = vadd.f32 %v148_v42, %v147_v41 }
  0xee   :  { %v150_v44 = vrot.slane %v149_v43, 2 }
  0xf0   :  { %v151_v45 = vadd.f32 %v150_v44, %v149_v43 }
  0xf2   :  { %v152_v46 = vrot.slane %v151_v45, 1 }
  0xf4   :  { %v153_v47 = vadd.f32 %v152_v46, %v151_v45 }
  0xf6   :  { %174 = vpush %v153_v47 }
 0x127   :  { %s175_s21 = spop %174 }
 0x128   :  { %s155_s22 = ssub.f32 0.0, %s175_s21 }
 0x12a   :  { %v156_v48 = vstv %s155_s22 }
 0x12b   :  { %157 = vst [vmem:[#allocation7] sm:$0xff] %v156_v48 }
 0x12c   :  { %252 = shalt.err (!%p249_p0)
}
 0x12d   :  { %167 = dma.vmem_to_hbm [thread:$0]  %s165_s1, 128, %s344_s2, [#allocation4]  }
 0x12e   :  { %265 = dma.done.wait [#allocation4], 128  }
 0x12f   :  { %266 = vsyncadd [#allocation4], 4294967168 }
 0x130   :  { %171 = vsyncpa [#allocation3], 1 }
 0x131   :  { %172 = vsyncpa [#allocation6], 1 }
 0x132   :  { %173 = vsyncpa [#allocation4], 1 }

</bundles_post_ra>
